<compile_context>
chip_gen: v7x
topology: tpu7x:2x2x1
jax: 0.10.0
libtpu: 0.0.40
codegen_flags: <defaults>
</compile_context>

<pallas_src>
import jax
import jax.numpy as jnp
from jax import lax
from jax.experimental import pallas as pl
from jax.experimental.pallas import tpu as pltpu


def _round_up(x, m):
    return -(-x // m) * m


def _chip_defaults():
    """Returns (num_tensorcore_slices, default max_block_bytes)."""
    try:
        kind = jax.devices()[0].device_kind.lower()
    except Exception:  # pragma: no cover - defensive only
        kind = ""
    if "v7" in kind:
        # 2 TensorCores per chip; faster HBM -> bigger blocks amortize the
        # per-grid-step overhead. 2 x 8 MiB double buffer stays well under
        # the 32 MiB scoped-VMEM default (64 MiB physical per TC).
        return 2, 8 * 1024 * 1024
    # v5e / v6e: single TensorCore. 4 MiB blocks are already past the DMA
    # efficiency knee and 2 x 4 MiB fits v5e's 16 MiB scoped-VMEM default.
    return 1, 4 * 1024 * 1024


def _make_act_sum_kernel(rows, tile_rows, lanes, tiles_per_slice, needs_mask):
    """Builds the reduction kernel for a (rows, lanes) slab."""

    def _fold(x):
        # (tile_rows, lanes) -> (8, lanes): layout-trivial reshape, leading
        # axis sum is elementwise vreg adds (VPU only, no XLU).
        return jnp.sum(x.reshape(-1, 8, lanes), axis=0)

    def kernel(r_ref, out_ref, acc_ref):
        k = pl.program_id(1)

        @pl.when(k == 0)
        def _():
            acc_ref[...] = jnp.zeros_like(acc_ref)

        if needs_mask:
            # Only the single ragged last tile pays for the mask; interior
            # tiles run the bare fold (kept purely DMA-bound).
            g = pl.program_id(0) * tiles_per_slice + k
            is_edge = (g + 1) * tile_rows > rows

            @pl.when(jnp.logical_not(is_edge))
            def _():
                acc_ref[...] += _fold(r_ref[...].astype(jnp.float32))

            @pl.when(is_edge)
            def _():
                # Rows past the true end hold undefined VMEM; zero them with
                # a select (NOT arithmetic masking, which would propagate
                # NaN/Inf garbage).
                row_ids = g * tile_rows + lax.broadcasted_iota(
                    jnp.int32, (tile_rows, 1), 0)
                x = jnp.where(row_ids < rows,
                              r_ref[...].astype(jnp.float32), 0.0)
                acc_ref[...] += _fold(x)
        else:
            acc_ref[...] += _fold(r_ref[...].astype(jnp.float32))

        @pl.when(k == pl.num_programs(1) - 1)
        def _():
            # Single cross-lane/sublane reduce per slice, done once.
            out_ref[...] = jnp.sum(acc_ref[...]).reshape(1, 1, 1)

    return kernel


_LANE_CANDIDATES = (512, 256, 128)


def act_loss_forward(weight, weight_loss, remain_value, *,
                     max_block_bytes=None,
                     small_bytes_threshold=256 * 1024,
                     force_num_slices=None):
    """Pallas equivalent of ACT_Loss.forward: returns remain_value.sum().

    `weight` and `weight_loss` participate only in the backward pass of the
    original autograd.Function, so they are accepted for API parity but not
    read on the forward hot path.
    """
    del weight, weight_loss  # only used by the backward pass
    # TODO(synk): the custom-VJP backward (grad_weight = g * weight_loss,
    # grad_remain = broadcast(g)) is not wired here; forward only.

    flat = remain_value.reshape(-1)
    n = flat.shape[0]
    itemsize = jnp.dtype(remain_value.dtype).itemsize

    # Tiny inputs: pallas_call launch / pipeline overhead dominates.
    if n * itemsize < small_bytes_threshold:
        return jnp.sum(remain_value)

    num_slices, default_block_bytes = _chip_defaults()
    if force_num_slices is not None:
        num_slices = int(force_num_slices)
    if max_block_bytes is None:
        max_block_bytes = default_block_bytes

    lanes = next((w for w in _LANE_CANDIDATES if n // w >= 8), None)
    if lanes is None:
        return jnp.sum(remain_value)

    rows = n // lanes            # rows covered by the Pallas kernel
    tail = n - rows * lanes      # < lanes leftover elements (XLA-summed)

    # Block rows: ~max_block_bytes per input buffer, multiple of 8 sublanes.
    max_tile_rows = max(8, (max_block_bytes // (lanes * itemsize)) // 8 * 8)
    tile_rows = max(8, min(max_tile_rows, _round_up(rows, 8)))
    tiles_total = pl.cdiv(rows, tile_rows)

    # Two slices only help when two TensorCores exist (v7x); on a single TC
    # the extra slice is pure overhead. Never create phantom tiles: make
    # tiles_total an exact multiple of num_slices (shrinking tile_rows keeps
    # VMEM use bounded) or drop the split.
    if num_slices > 1:
        if tiles_total < num_slices:
            num_slices = 1
        elif tiles_total % num_slices != 0:
            even_tiles = _round_up(tiles_total, num_slices)
            tile_rows = max(8, _round_up(pl.cdiv(rows, even_tiles), 8))
            tiles_total = pl.cdiv(rows, tile_rows)
            if tiles_total % num_slices != 0:
                # Rare pathological shape: single slice is still correct and
                # avoids any wasted block DMA.
                num_slices = 1

    tiles_per_slice = tiles_total // num_slices
    needs_mask = tiles_total * tile_rows != rows   # ragged last tile only

    r = flat[: rows * lanes].reshape(rows, lanes)  # lane-dense slab

    kernel = _make_act_sum_kernel(rows, tile_rows, lanes, tiles_per_slice,
                                  needs_mask)

    partials = pl.pallas_call(
        kernel,
        out_shape=jax.ShapeDtypeStruct((num_slices, 1, 1), jnp.float32),
        grid_spec=pltpu.PrefetchScalarGridSpec(
            num_scalar_prefetch=0,
            grid=(num_slices, tiles_per_slice),
            in_specs=[pl.BlockSpec((tile_rows, lanes),
                                   lambda p, k: (p * tiles_per_slice + k, 0))],
            out_specs=pl.BlockSpec((1, 1, 1), lambda p, k: (p, 0, 0)),
            scratch_shapes=[pltpu.VMEM((8, lanes), jnp.float32)],
        ),
        compiler_params=pltpu.CompilerParams(
            dimension_semantics=("parallel", "arbitrary"),
        ),
        cost_estimate=pl.CostEstimate(
            flops=rows * lanes, transcendentals=0,
            bytes_accessed=rows * lanes * itemsize + num_slices * 4),
    )(r)

    total = jnp.sum(partials)
    if tail:
        total = total + jnp.sum(flat[rows * lanes:].astype(jnp.float32))
    return total.astype(remain_value.dtype)


if __name__ == "__main__":
    key = jax.random.PRNGKey(0)
    k_w, k_wl, k1, k2, k3, k4, k5 = jax.random.split(key, 7)

    # weight / weight_loss only feed the (unimplemented) backward pass; they
    # are reused unchanged for every case below.
    B, S, D = 2, 8, 16
    weight = jax.random.normal(k_w, (B, S, D), dtype=jnp.float32)
    weight_loss = jax.random.normal(k_wl, (B, S, D), dtype=jnp.float32)

    def check(rv, **kw):
        out = jax.block_until_ready(act_loss_forward(weight, weight_loss, rv, **kw))
        ref = jnp.sum(rv)
        assert jnp.allclose(out, ref, rtol=1e-3, atol=1e-1), (out, ref)

    # 1) Tiny module-scale shape -> small-input bypass path.
    rv1 = jax.random.normal(k1, (B, S, D), dtype=jnp.float32)
    check(rv1)

    # 2) Single-tile Pallas path: no masking, no tail, 1 slice.
    rv2 = jax.random.normal(k2, (4, 128, 256), dtype=jnp.float32)
    check(rv2)

    # 3) Multi-tile with forced 2-slice split: odd->even tile rebalance (no
    #    phantom tile) plus ragged edge tile masked under pl.when.
    rv3 = jax.random.normal(k3, (4, 312, 256), dtype=jnp.float32)
    check(rv3, max_block_bytes=96 * 512 * 4, force_num_slices=2)

    # 4) Even multi-tile 2-slice split with no masking at all.
    rv4 = jax.random.normal(k4, (4, 256, 256), dtype=jnp.float32)
    check(rv4, max_block_bytes=128 * 512 * 4, force_num_slices=2)

    # 5) Flat size not a multiple of 512 -> Pallas prefix + small XLA tail.
    rv5 = jax.random.normal(k5, (3, 217, 129), dtype=jnp.float32)
    check(rv5)

    print("KERNEL_OK")
</pallas_src>

<mosaic_0001>
module attributes {stable_mosaic.version = 11 : i64} {
  func.func @kernel(%arg0: i32, %arg1: i32, %arg2: memref<256x512xf32, #tpu.memory_space<vmem>>, %arg3: memref<1x1x1xf32, #tpu.memory_space<vmem>>, %arg4: memref<8x512xf32, #tpu.memory_space<vmem>>) attributes {dimension_semantics = [#tpu.dimension_semantics<parallel>, #tpu.dimension_semantics<arbitrary>], iteration_bounds = array<i64: 1, 1>, scalar_prefetch = 0 : i64, scratch_operands = 1 : i64, tpu.core_type = #tpu.core_type<tc>, window_params = [{transform_indices = @transform_0, window_bounds = array<i64: 256, 512>}, {transform_indices = @transform_1, window_bounds = array<i64: 1, 1, 1>}]} {
    %c0_i32 = arith.constant 0 : i32
    %0 = arith.cmpi eq, %arg1, %c0_i32 : i32
    %1 = arith.extui %0 : i1 to i32
    %c0_i32_0 = arith.constant 0 : i32
    %2 = arith.cmpi ne, %1, %c0_i32_0 : i32
    scf.if %2 {
      %cst_8 = arith.constant 0.000000e+00 : f32
      %12 = vector.broadcast %cst_8 : f32 to vector<8x512xf32>
      %c0_9 = arith.constant 0 : index
      %c0_10 = arith.constant 0 : index
      %13 = vector.load %arg4[%c0_9, %c0_10] : memref<8x512xf32, #tpu.memory_space<vmem>>, vector<8x512xf32>
      tpu.vector_store %arg4[%c0_9, %c0_10], %12 {strides = array<i32>} : memref<8x512xf32, #tpu.memory_space<vmem>>, vector<8x512xf32>,
    } else {
    }
    %c0 = arith.constant 0 : index
    %c0_1 = arith.constant 0 : index
    %3 = vector.load %arg4[%c0, %c0_1] : memref<8x512xf32, #tpu.memory_space<vmem>>, vector<8x512xf32>
    %c0_2 = arith.constant 0 : index
    %c0_3 = arith.constant 0 : index
    %4 = vector.load %arg2[%c0_2, %c0_3] : memref<256x512xf32, #tpu.memory_space<vmem>>, vector<256x512xf32>
    %5 = vector.shape_cast %4 : vector<256x512xf32> to vector<32x8x512xf32>
    %cst = arith.constant dense<0.000000e+00> : vector<8x512xf32>
    %6 = vector.multi_reduction <add>, %5, %cst [0] : vector<32x8x512xf32> to vector<8x512xf32>
    %7 = arith.addf %3, %6 : vector<8x512xf32>
    %c0_4 = arith.constant 0 : index
    %c0_5 = arith.constant 0 : index
    %8 = vector.load %arg4[%c0_4, %c0_5] : memref<8x512xf32, #tpu.memory_space<vmem>>, vector<8x512xf32>
    tpu.vector_store %arg4[%c0_4, %c0_5], %7 {strides = array<i32>} : memref<8x512xf32, #tpu.memory_space<vmem>>, vector<8x512xf32>,
    %c0_i32_6 = arith.constant 0 : i32
    %9 = arith.cmpi eq, %arg1, %c0_i32_6 : i32
    %10 = arith.extui %9 : i1 to i32
    %c0_i32_7 = arith.constant 0 : i32
    %11 = arith.cmpi ne, %10, %c0_i32_7 : i32
    scf.if %11 {
      %c0_8 = arith.constant 0 : index
      %c0_9 = arith.constant 0 : index
      %12 = vector.load %arg4[%c0_8, %c0_9] : memref<8x512xf32, #tpu.memory_space<vmem>>, vector<8x512xf32>
      %13 = vector.shape_cast %12 : vector<8x512xf32> to vector<1x8x512xf32>
      %cst_10 = arith.constant dense<0.000000e+00> : vector<1xf32>
      %14 = vector.multi_reduction <add>, %13, %cst_10 [1, 2] : vector<1x8x512xf32> to vector<1xf32>
      %15 = vector.shape_cast %14 : vector<1xf32> to vector<1x1x1xf32>
      %16 = vector.extract %15[0, 0, 0] : f32 from vector<1x1x1xf32>
      %17 = vector.broadcast %16 : f32 to vector<1x1x1xf32>
      %c0_11 = arith.constant 0 : index
      %c0_12 = arith.constant 0 : index
      %c0_13 = arith.constant 0 : index
      %18 = vector.load %arg3[%c0_11, %c0_12, %c0_13] : memref<1x1x1xf32, #tpu.memory_space<vmem>>, vector<1x1x1xf32>
      tpu.vector_store %arg3[%c0_11, %c0_12, %c0_13], %17 {strides = array<i32>} : memref<1x1x1xf32, #tpu.memory_space<vmem>>, vector<1x1x1xf32>,
    } else {
    }
    return
  }
  func.func @transform_0(%arg0: i32, %arg1: i32) -> (i32, i32) {
    %c1_i32 = arith.constant 1 : i32
    %0 = arith.muli %arg0, %c1_i32 : i32
    %1 = arith.addi %0, %arg1 : i32
    %c0_i32 = arith.constant 0 : i32
    %c0_i32_0 = arith.constant 0 : i32
    return %1, %c0_i32 : i32, i32
  }
  func.func @transform_1(%arg0: i32, %arg1: i32) -> (i32, i32, i32) {
    %c0_i32 = arith.constant 0 : i32
    %c0_i32_0 = arith.constant 0 : i32
    %c0_i32_1 = arith.constant 0 : i32
    return %arg0, %c0_i32, %c0_i32_0 : i32, i32, i32
  }
}

</mosaic_0001>

<bundles_post_ra>
// kernel: tpu_custom_call.1
= control target key start
LH: loop header
LB: loop body
LE: loop exit
PB: predicated region body
PF: predicated region fallthrough
CT: control target
= control target key end

     0   :  { %6 = vsyncpa [#allocation4], 0  ;;  %s431_s0 = inlined_call_operand.hbm [shape: f32[256,512], index: 0, kind: input, shape index: {}]   ;;  %s432_s1 = inlined_call_operand.hbm [shape: f32[1,1,1], index: 1, kind: output, shape index: {}]  }
   0x1   :  { %7 = vsyncpa [#allocation5], 0  ;;  %s393_s6 = smov [#allocation3]   ;;  %s345_s10 = scalar_lea.hbm %s431_s0, 16384 }
   0x2   :  { %s18_s7 = sshll.u32 %s393_s6, 4  ;;  %p346_p0 = scmp.ne.s32.totalorder %s431_s0, %s345_s10  ;;  %s19_s7 = int_to_ptr.vmem [resolvable:$true] %s18_s7 }
   0x3   :  { %p349_p1 = scmp.lt.u32.totalorder %s345_s10, %s431_s0 }
   0x5   :  { %p351_p2 = pnand %p349_p1, %p346_p0 }
   0x7   :  { %354 = shalt.err (!%p351_p2)
}
   0x8   :  { %s355_s15 = scalar_lea.vmem %s19_s7, 16384  ;;  %p360_p4 = scmp.lt.s32.totalorder %s19_s7, %s19_s7 }
   0x9   :  { %p356_p3 = scmp.ne.s32.totalorder %s19_s7, %s355_s15  ;;  %p361_p5 = scmp.lt.s32.totalorder %s355_s15, %s355_s15 }
   0xb   :  { %p362_p6 = por %p361_p5, %p360_p4 }
   0xd   :  { %p363_p7 = pnand %p362_p6, %p356_p3 }
   0xf   :  { %366 = shalt.err (!%p363_p7)
}
  0x10   :  { %s394_s16 = smov 512   ;;  %s395_s17 = smov 32  }
  0x11   :  { %24 = dma.hbm_to_vmem [thread:$0]  %s431_s0, 16384, %s19_s7, [#allocation4], %s394_s16, %s394_s16, %s395_s17  }
  0x12   :  { %389 = dma.done.wait [#allocation4], 16384  }
  0x13   :  { %390 = vsyncadd [#allocation4], 4294950912  ;;  %v42_v0 = vld [vmem:[#allocation3] sm:$0xff]  ;;  %v43_v1 = vld [vmem:[#allocation3 + $0x8] sm:$0xff]  ;;  %s396_s0 = smov [#allocation6]   ;;  %vm322_vm0 = vcmask 0  }
  0x14   :  { %v44_v2 = vld [vmem:[#allocation3 + $0x10] sm:$0xff]  ;;  %v45_v3 = vld [vmem:[#allocation3 + $0x18] sm:$0xff]  ;;  %v46_v4 = vld [vmem:[#allocation3 + $0x20] sm:$0xff]  ;;  %s330_s20 = sshll.u32 %s396_s0, 4  ;;  %s331_s20 = int_to_ptr.vmem [resolvable:$true] %s330_s20 }
  0x15   :  { %v47_v5 = vld [vmem:[#allocation3 + $0x28] sm:$0xff]  ;;  %v48_v6 = vld [vmem:[#allocation3 + $0x30] sm:$0xff]  ;;  %v49_v7 = vld [vmem:[#allocation3 + $0x38] sm:$0xff]  ;;  %v170_v9 = vadd.f32 %v46_v4, %v42_v0  ;;  %s367_s22 = scalar_lea.vmem %s331_s20, 16  ;;  %s371_s23 = scalar_lea.vmem %s331_s20, 32 }
  0x16   :  { %v50_v8 = vld [vmem:[#allocation3 + $0x40] sm:$0xff]  ;;  %v201_v10 = vadd.f32 %v47_v5, %v43_v1  ;;  %v51_v11 = vld [vmem:[#allocation3 + $0x48] sm:$0xff]  ;;  %v52_v12 = vld [vmem:[#allocation3 + $0x50] sm:$0xff]  ;;  %v232_v14 = vadd.f32 %v48_v6, %v44_v2  ;;  %v263_v15 = vadd.f32 %v49_v7, %v45_v3  ;;  %p368_p8 = scmp.ne.s32.totalorder %s331_s20, %s367_s22  ;;  %p372_p9 = scmp.lt.s32.totalorder %s331_s20, %s331_s20 }
  0x17   :  { %v53_v13 = vld [vmem:[#allocation3 + $0x58] sm:$0xff]  ;;  %v54_v16 = vld [vmem:[#allocation3 + $0x60] sm:$0xff]  ;;  %v55_v17 = vld [vmem:[#allocation3 + $0x68] sm:$0xff]  ;;  %v171_v19 = vadd.f32 %v170_v9, %v50_v8  ;;  %p373_p10 = scmp.lt.s32.totalorder %s371_s23, %s367_s22 }
  0x18   :  { %v56_v18 = vld [vmem:[#allocation3 + $0x70] sm:$0xff]  ;;  %v202_v20 = vadd.f32 %v201_v10, %v51_v11  ;;  %v57_v21 = vld [vmem:[#allocation3 + $0x78] sm:$0xff]  ;;  %v58_v22 = vld [vmem:[#allocation3 + $0x80] sm:$0xff]  ;;  %v233_v24 = vadd.f32 %v232_v14, %v52_v12  ;;  %v264_v25 = vadd.f32 %v263_v15, %v53_v13 }
  0x19   :  { %v59_v23 = vld [vmem:[#allocation3 + $0x88] sm:$0xff]  ;;  %v60_v26 = vld [vmem:[#allocation3 + $0x90] sm:$0xff]  ;;  %v61_v27 = vld [vmem:[#allocation3 + $0x98] sm:$0xff]  ;;  %v172_v28 = vadd.f32 %v171_v19, %v54_v16  ;;  %p374_p11 = por %p373_p10, %p372_p9 }
  0x1a   :  { %v203_v29 = vadd.f32 %v202_v20, %v55_v17  ;;  %v62_v30 = vld [vmem:[#allocation3 + $0xa0] sm:$0xff]  ;;  %v63_v31 = vld [vmem:[#allocation3 + $0xa8] sm:$0xff]  ;;  %v234_v32 = vadd.f32 %v233_v24, %v56_v18  ;;  %v265_v33 = vadd.f32 %v264_v25, %v57_v21  ;;  %v64_v34 = vld [vmem:[#allocation3 + $0xb0] sm:$0xff] }
  0x1b   :  { %v65_v35 = vld [vmem:[#allocation3 + $0xb8] sm:$0xff]  ;;  %v173_v36 = vadd.f32 %v172_v28, %v58_v22  ;;  %v66_v38 = vld [vmem:[#allocation3 + $0xc0] sm:$0xff]  ;;  %v67_v39 = vld [vmem:[#allocation3 + $0xc8] sm:$0xff]  ;;  %p375_p12 = pnand %p374_p11, %p368_p8 }
  0x1c   :  { %v204_v37 = vadd.f32 %v203_v29, %v59_v23  ;;  %v235_v40 = vadd.f32 %v234_v32, %v60_v26  ;;  %v266_v41 = vadd.f32 %v265_v33, %v61_v27  ;;  %v68_v42 = vld [vmem:[#allocation3 + $0xd0] sm:$0xff]  ;;  %v69_v43 = vld [vmem:[#allocation3 + $0xd8] sm:$0xff]  ;;  %v70_v46 = vld [vmem:[#allocation3 + $0xe0] sm:$0xff] }
  0x1d   :  { %v174_v44 = vadd.f32 %v173_v36, %v62_v30  ;;  %v71_v47 = vld [vmem:[#allocation3 + $0xe8] sm:$0xff]  ;;  %v72_v50 = vld [vmem:[#allocation3 + $0xf0] sm:$0xff]  ;;  %v73_v51 = vld [vmem:[#allocation3 + $0xf8] sm:$0xff] }
  0x1e   :  { %v205_v45 = vadd.f32 %v204_v37, %v63_v31  ;;  %v236_v48 = vadd.f32 %v235_v40, %v64_v34  ;;  %v267_v49 = vadd.f32 %v266_v41, %v65_v35  ;;  %v74_v54 = vld [vmem:[#allocation3 + $0x100] sm:$0xff]  ;;  %v75_v55 = vld [vmem:[#allocation3 + $0x108] sm:$0xff]  ;;  %v76_v58 = vld [vmem:[#allocation3 + $0x110] sm:$0xff] }
  0x1f   :  { %v175_v52 = vadd.f32 %v174_v44, %v66_v38  ;;  %v77_v59 = vld [vmem:[#allocation3 + $0x118] sm:$0xff]  ;;  %v78_v62 = vld [vmem:[#allocation3 + $0x120] sm:$0xff]  ;;  %v79_v63 = vld [vmem:[#allocation3 + $0x128] sm:$0xff] }
  0x20   :  { %v206_v53 = vadd.f32 %v205_v45, %v67_v39  ;;  %v237_v56 = vadd.f32 %v236_v48, %v68_v42  ;;  %v268_v57 = vadd.f32 %v267_v49, %v69_v43  ;;  %v80_v2 = vld [vmem:[#allocation3 + $0x130] sm:$0xff]  ;;  %v81_v3 = vld [vmem:[#allocation3 + $0x138] sm:$0xff]  ;;  %v82_v6 = vld [vmem:[#allocation3 + $0x140] sm:$0xff] }
  0x21   :  { %v176_v60 = vadd.f32 %v175_v52, %v70_v46  ;;  %v83_v7 = vld [vmem:[#allocation3 + $0x148] sm:$0xff]  ;;  %v84_v10 = vld [vmem:[#allocation3 + $0x150] sm:$0xff]  ;;  %v85_v11 = vld [vmem:[#allocation3 + $0x158] sm:$0xff] }
  0x22   :  { %v207_v61 = vadd.f32 %v206_v53, %v71_v47  ;;  %v238_v0 = vadd.f32 %v237_v56, %v72_v50  ;;  %v269_v1 = vadd.f32 %v268_v57, %v73_v51  ;;  %v86_v14 = vld [vmem:[#allocation3 + $0x160] sm:$0xff]  ;;  %v87_v15 = vld [vmem:[#allocation3 + $0x168] sm:$0xff]  ;;  %v88_v18 = vld [vmem:[#allocation3 + $0x170] sm:$0xff] }
  0x23   :  { %v177_v4 = vadd.f32 %v176_v60, %v74_v54  ;;  %v89_v19 = vld [vmem:[#allocation3 + $0x178] sm:$0xff]  ;;  %v90_v22 = vld [vmem:[#allocation3 + $0x180] sm:$0xff]  ;;  %v91_v23 = vld [vmem:[#allocation3 + $0x188] sm:$0xff] }
  0x24   :  { %v208_v5 = vadd.f32 %v207_v61, %v75_v55  ;;  %v239_v8 = vadd.f32 %v238_v0, %v76_v58  ;;  %v270_v9 = vadd.f32 %v269_v1, %v77_v59  ;;  %v92_v26 = vld [vmem:[#allocation3 + $0x190] sm:$0xff]  ;;  %v93_v27 = vld [vmem:[#allocation3 + $0x198] sm:$0xff]  ;;  %v94_v30 = vld [vmem:[#allocation3 + $0x1a0] sm:$0xff] }
  0x25   :  { %v178_v12 = vadd.f32 %v177_v4, %v78_v62  ;;  %v95_v31 = vld [vmem:[#allocation3 + $0x1a8] sm:$0xff]  ;;  %v96_v34 = vld [vmem:[#allocation3 + $0x1b0] sm:$0xff]  ;;  %v97_v35 = vld [vmem:[#allocation3 + $0x1b8] sm:$0xff] }
  0x26   :  { %v209_v13 = vadd.f32 %v208_v5, %v79_v63  ;;  %v240_v16 = vadd.f32 %v239_v8, %v80_v2  ;;  %v271_v17 = vadd.f32 %v270_v9, %v81_v3  ;;  %v98_v38 = vld [vmem:[#allocation3 + $0x1c0] sm:$0xff]  ;;  %v99_v39 = vld [vmem:[#allocation3 + $0x1c8] sm:$0xff]  ;;  %v100_v42 = vld [vmem:[#allocation3 + $0x1d0] sm:$0xff] }
  0x27   :  { %v179_v20 = vadd.f32 %v178_v12, %v82_v6  ;;  %v101_v43 = vld [vmem:[#allocation3 + $0x1d8] sm:$0xff]  ;;  %v102_v46 = vld [vmem:[#allocation3 + $0x1e0] sm:$0xff]  ;;  %v103_v47 = vld [vmem:[#allocation3 + $0x1e8] sm:$0xff] }
  0x28   :  { %v210_v21 = vadd.f32 %v209_v13, %v83_v7  ;;  %v241_v24 = vadd.f32 %v240_v16, %v84_v10  ;;  %v272_v25 = vadd.f32 %v271_v17, %v85_v11  ;;  %v104_v50 = vld [vmem:[#allocation3 + $0x1f0] sm:$0xff]  ;;  %v105_v51 = vld [vmem:[#allocation3 + $0x1f8] sm:$0xff]  ;;  %v106_v54 = vld [vmem:[#allocation3 + $0x200] sm:$0xff] }
  0x29   :  { %v180_v28 = vadd.f32 %v179_v20, %v86_v14  ;;  %v107_v55 = vld [vmem:[#allocation3 + $0x208] sm:$0xff]  ;;  %v108_v58 = vld [vmem:[#allocation3 + $0x210] sm:$0xff]  ;;  %v109_v59 = vld [vmem:[#allocation3 + $0x218] sm:$0xff] }
  0x2a   :  { %v211_v29 = vadd.f32 %v210_v21, %v87_v15  ;;  %v242_v32 = vadd.f32 %v241_v24, %v88_v18  ;;  %v273_v33 = vadd.f32 %v272_v25, %v89_v19  ;;  %v110_v62 = vld [vmem:[#allocation3 + $0x220] sm:$0xff]  ;;  %v111_v63 = vld [vmem:[#allocation3 + $0x228] sm:$0xff]  ;;  %v112_v2 = vld [vmem:[#allocation3 + $0x230] sm:$0xff] }
  0x2b   :  { %v181_v36 = vadd.f32 %v180_v28, %v90_v22  ;;  %v113_v3 = vld [vmem:[#allocation3 + $0x238] sm:$0xff]  ;;  %v114_v6 = vld [vmem:[#allocation3 + $0x240] sm:$0xff]  ;;  %v115_v7 = vld [vmem:[#allocation3 + $0x248] sm:$0xff] }
  0x2c   :  { %v212_v37 = vadd.f32 %v211_v29, %v91_v23  ;;  %v243_v40 = vadd.f32 %v242_v32, %v92_v26  ;;  %v274_v41 = vadd.f32 %v273_v33, %v93_v27  ;;  %v116_v10 = vld [vmem:[#allocation3 + $0x250] sm:$0xff]  ;;  %v117_v11 = vld [vmem:[#allocation3 + $0x258] sm:$0xff]  ;;  %v118_v14 = vld [vmem:[#allocation3 + $0x260] sm:$0xff] }
  0x2d   :  { %v182_v44 = vadd.f32 %v181_v36, %v94_v30  ;;  %v119_v15 = vld [vmem:[#allocation3 + $0x268] sm:$0xff]  ;;  %v120_v18 = vld [vmem:[#allocation3 + $0x270] sm:$0xff]  ;;  %v121_v19 = vld [vmem:[#allocation3 + $0x278] sm:$0xff] }
  0x2e   :  { %v213_v45 = vadd.f32 %v212_v37, %v95_v31  ;;  %v244_v48 = vadd.f32 %v243_v40, %v96_v34  ;;  %v275_v49 = vadd.f32 %v274_v41, %v97_v35  ;;  %v122_v22 = vld [vmem:[#allocation3 + $0x280] sm:$0xff]  ;;  %v123_v23 = vld [vmem:[#allocation3 + $0x288] sm:$0xff]  ;;  %v124_v26 = vld [vmem:[#allocation3 + $0x290] sm:$0xff] }
  0x2f   :  { %v183_v52 = vadd.f32 %v182_v44, %v98_v38  ;;  %v125_v27 = vld [vmem:[#allocation3 + $0x298] sm:$0xff]  ;;  %v126_v30 = vld [vmem:[#allocation3 + $0x2a0] sm:$0xff]  ;;  %v127_v31 = vld [vmem:[#allocation3 + $0x2a8] sm:$0xff] }
  0x30   :  { %v214_v53 = vadd.f32 %v213_v45, %v99_v39  ;;  %v245_v56 = vadd.f32 %v244_v48, %v100_v42  ;;  %v276_v57 = vadd.f32 %v275_v49, %v101_v43  ;;  %v128_v34 = vld [vmem:[#allocation3 + $0x2b0] sm:$0xff]  ;;  %v129_v35 = vld [vmem:[#allocation3 + $0x2b8] sm:$0xff]  ;;  %v130_v38 = vld [vmem:[#allocation3 + $0x2c0] sm:$0xff] }
  0x31   :  { %v184_v60 = vadd.f32 %v183_v52, %v102_v46  ;;  %v131_v39 = vld [vmem:[#allocation3 + $0x2c8] sm:$0xff]  ;;  %v132_v42 = vld [vmem:[#allocation3 + $0x2d0] sm:$0xff]  ;;  %v133_v43 = vld [vmem:[#allocation3 + $0x2d8] sm:$0xff] }
  0x32   :  { %v215_v61 = vadd.f32 %v214_v53, %v103_v47  ;;  %v246_v0 = vadd.f32 %v245_v56, %v104_v50  ;;  %v277_v1 = vadd.f32 %v276_v57, %v105_v51  ;;  %v134_v46 = vld [vmem:[#allocation3 + $0x2e0] sm:$0xff]  ;;  %v135_v47 = vld [vmem:[#allocation3 + $0x2e8] sm:$0xff]  ;;  %v136_v50 = vld [vmem:[#allocation3 + $0x2f0] sm:$0xff] }
  0x33   :  { %v185_v4 = vadd.f32 %v184_v60, %v106_v54  ;;  %v137_v51 = vld [vmem:[#allocation3 + $0x2f8] sm:$0xff]  ;;  %v138_v54 = vld [vmem:[#allocation3 + $0x300] sm:$0xff] }
  0x34   :  { %v216_v5 = vadd.f32 %v215_v61, %v107_v55  ;;  %v247_v8 = vadd.f32 %v246_v0, %v108_v58  ;;  %v278_v9 = vadd.f32 %v277_v1, %v109_v59  ;;  %v139_v55 = vld [vmem:[#allocation3 + $0x308] sm:$0xff]  ;;  %v140_v58 = vld [vmem:[#allocation3 + $0x310] sm:$0xff]  ;;  %v141_v59 = vld [vmem:[#allocation3 + $0x318] sm:$0xff] }
  0x35   :  { %v186_v12 = vadd.f32 %v185_v4, %v110_v62  ;;  %v142_v62 = vld [vmem:[#allocation3 + $0x320] sm:$0xff] }
  0x36   :  { %v217_v13 = vadd.f32 %v216_v5, %v111_v63  ;;  %v248_v16 = vadd.f32 %v247_v8, %v112_v2  ;;  %v279_v17 = vadd.f32 %v278_v9, %v113_v3  ;;  %v143_v63 = vld [vmem:[#allocation3 + $0x328] sm:$0xff]  ;;  %v144_v2 = vld [vmem:[#allocation3 + $0x330] sm:$0xff]  ;;  %v145_v3 = vld [vmem:[#allocation3 + $0x338] sm:$0xff] }
  0x37   :  { %v187_v20 = vadd.f32 %v186_v12, %v114_v6  ;;  %v146_v6 = vld [vmem:[#allocation3 + $0x340] sm:$0xff] }
  0x38   :  { %v218_v21 = vadd.f32 %v217_v13, %v115_v7  ;;  %v249_v24 = vadd.f32 %v248_v16, %v116_v10  ;;  %v280_v25 = vadd.f32 %v279_v17, %v117_v11  ;;  %v147_v7 = vld [vmem:[#allocation3 + $0x348] sm:$0xff]  ;;  %v148_v10 = vld [vmem:[#allocation3 + $0x350] sm:$0xff]  ;;  %v149_v11 = vld [vmem:[#allocation3 + $0x358] sm:$0xff] }
  0x39   :  { %v188_v28 = vadd.f32 %v187_v20, %v118_v14  ;;  %v150_v14 = vld [vmem:[#allocation3 + $0x360] sm:$0xff] }
  0x3a   :  { %v219_v29 = vadd.f32 %v218_v21, %v119_v15  ;;  %v250_v32 = vadd.f32 %v249_v24, %v120_v18  ;;  %v281_v33 = vadd.f32 %v280_v25, %v121_v19  ;;  %v151_v15 = vld [vmem:[#allocation3 + $0x368] sm:$0xff]  ;;  %v152_v18 = vld [vmem:[#allocation3 + $0x370] sm:$0xff]  ;;  %v153_v19 = vld [vmem:[#allocation3 + $0x378] sm:$0xff] }
  0x3b   :  { %v189_v36 = vadd.f32 %v188_v28, %v122_v22  ;;  %v154_v22 = vld [vmem:[#allocation3 + $0x380] sm:$0xff] }
  0x3c   :  { %v220_v37 = vadd.f32 %v219_v29, %v123_v23  ;;  %v251_v40 = vadd.f32 %v250_v32, %v124_v26  ;;  %v282_v41 = vadd.f32 %v281_v33, %v125_v27  ;;  %v155_v23 = vld [vmem:[#allocation3 + $0x388] sm:$0xff]  ;;  %v156_v26 = vld [vmem:[#allocation3 + $0x390] sm:$0xff]  ;;  %v157_v27 = vld [vmem:[#allocation3 + $0x398] sm:$0xff] }
  0x3d   :  { %v190_v44 = vadd.f32 %v189_v36, %v126_v30  ;;  %v158_v30 = vld [vmem:[#allocation3 + $0x3a0] sm:$0xff] }
  0x3e   :  { %v221_v45 = vadd.f32 %v220_v37, %v127_v31  ;;  %v252_v48 = vadd.f32 %v251_v40, %v128_v34  ;;  %v283_v49 = vadd.f32 %v282_v41, %v129_v35  ;;  %v159_v31 = vld [vmem:[#allocation3 + $0x3a8] sm:$0xff]  ;;  %v160_v34 = vld [vmem:[#allocation3 + $0x3b0] sm:$0xff]  ;;  %v161_v35 = vld [vmem:[#allocation3 + $0x3b8] sm:$0xff] }
  0x3f   :  { %v191_v52 = vadd.f32 %v190_v44, %v130_v38  ;;  %v162_v38 = vld [vmem:[#allocation3 + $0x3c0] sm:$0xff] }
  0x40   :  { %v222_v53 = vadd.f32 %v221_v45, %v131_v39  ;;  %v253_v56 = vadd.f32 %v252_v48, %v132_v42  ;;  %v284_v57 = vadd.f32 %v283_v49, %v133_v43  ;;  %v163_v39 = vld [vmem:[#allocation3 + $0x3c8] sm:$0xff]  ;;  %v164_v42 = vld [vmem:[#allocation3 + $0x3d0] sm:$0xff]  ;;  %v165_v43 = vld [vmem:[#allocation3 + $0x3d8] sm:$0xff] }
  0x41   :  { %v192_v60 = vadd.f32 %v191_v52, %v134_v46  ;;  %v166_v46 = vld [vmem:[#allocation3 + $0x3e0] sm:$0xff] }
  0x42   :  { %v223_v61 = vadd.f32 %v222_v53, %v135_v47  ;;  %v254_v0 = vadd.f32 %v253_v56, %v136_v50  ;;  %v285_v1 = vadd.f32 %v284_v57, %v137_v51  ;;  %v167_v47 = vld [vmem:[#allocation3 + $0x3e8] sm:$0xff]  ;;  %v168_v50 = vld [vmem:[#allocation3 + $0x3f0] sm:$0xff]  ;;  %v169_v53 = vld [vmem:[#allocation3 + $0x3f8] sm:$0xff] }
  0x43   :  { %v193_v4 = vadd.f32 %v192_v60, %v138_v54 }
  0x44   :  { %v224_v5 = vadd.f32 %v223_v61, %v139_v55  ;;  %v255_v8 = vadd.f32 %v254_v0, %v140_v58  ;;  %v286_v9 = vadd.f32 %v285_v1, %v141_v59 }
  0x45   :  { %v194_v12 = vadd.f32 %v193_v4, %v142_v62 }
  0x46   :  { %v225_v13 = vadd.f32 %v224_v5, %v143_v63  ;;  %v256_v16 = vadd.f32 %v255_v8, %v144_v2  ;;  %v287_v17 = vadd.f32 %v286_v9, %v145_v3 }
  0x47   :  { %v195_v20 = vadd.f32 %v194_v12, %v146_v6 }
  0x48   :  { %v226_v21 = vadd.f32 %v225_v13, %v147_v7  ;;  %v257_v24 = vadd.f32 %v256_v16, %v148_v10  ;;  %v288_v25 = vadd.f32 %v287_v17, %v149_v11 }
  0x49   :  { %v196_v28 = vadd.f32 %v195_v20, %v150_v14 }
  0x4a   :  { %v227_v29 = vadd.f32 %v226_v21, %v151_v15  ;;  %v258_v32 = vadd.f32 %v257_v24, %v152_v18  ;;  %v289_v33 = vadd.f32 %v288_v25, %v153_v19 }
  0x4b   :  { %v197_v36 = vadd.f32 %v196_v28, %v154_v22 }
  0x4c   :  { %v228_v37 = vadd.f32 %v227_v29, %v155_v23  ;;  %v259_v40 = vadd.f32 %v258_v32, %v156_v26  ;;  %v290_v41 = vadd.f32 %v289_v33, %v157_v27 }
  0x4d   :  { %v198_v44 = vadd.f32 %v197_v36, %v158_v30 }
  0x4e   :  { %v229_v45 = vadd.f32 %v228_v37, %v159_v31  ;;  %v260_v48 = vadd.f32 %v259_v40, %v160_v34  ;;  %v291_v49 = vadd.f32 %v290_v41, %v161_v35 }
  0x4f   :  { %v199_v51 = vadd.f32 %v198_v44, %v162_v38 }
  0x50   :  { %v230_v52 = vadd.f32 %v229_v45, %v163_v39  ;;  %v261_v54 = vadd.f32 %v260_v48, %v164_v42  ;;  %v292_v55 = vadd.f32 %v291_v49, %v165_v43 }
  0x51   :  { %v200_v56 = vadd.f32 %v199_v51, %v166_v46 }
  0x52   :  { %v231_v57 = vadd.f32 %v230_v52, %v167_v47  ;;  %v262_v58 = vadd.f32 %v261_v54, %v168_v50  ;;  %v293_v59 = vadd.f32 %v292_v55, %v169_v53 }
  0x54   :  { %v309_v60 = vadd.f32 %v231_v57, %v200_v56 }
  0x56   :  { %v310_v61 = vadd.f32 %v309_v60, %v262_v58 }
  0x58   :  { %v311_v62 = vadd.f32 %v310_v61, %v293_v59 }
  0x5a   :  { %312 = vadd.xlane.f32.xlu0 %v311_v62 }
  0xe7   :  { %v313_v63 = vpop.xlane.xlu0 %312 }
  0xe8   :  { %v314_v0 = vrot.slane %v313_v63, 4 }
  0xea   :  { %v315_v1 = vadd.f32 %v314_v0, %v313_v63 }
  0xec   :  { %v316_v2 = vrot.slane %v315_v1, 2 }
  0xee   :  { %v317_v3 = vadd.f32 %v316_v2, %v315_v1 }
  0xf0   :  { %v318_v4 = vrot.slane %v317_v3, 1 }
  0xf2   :  { %v319_v5 = vadd.f32 %v318_v4, %v317_v3 }
  0xf4   :  { %339 = vpush %v319_v5 }
 0x125   :  { %s340_s21 = spop %339 }
 0x126   :  { %v321_v6 = vstv %s340_s21 }
 0x127   :  { %323 = vst.msk [vmem:[#allocation6] sm:$0x1] %vm322_vm0, %v321_v6 }
 0x128   :  { %378 = shalt.err (!%p375_p12)
}
 0x129   :  { %s379_s26 = scalar_lea.hbm %s432_s1, 16 }
 0x12a   :  { %p380_p13 = scmp.ne.s32.totalorder %s432_s1, %s379_s26  ;;  %p383_p0 = scmp.lt.u32.totalorder %s379_s26, %s432_s1 }
 0x12c   :  { %p385_p1 = pnand %p383_p0, %p380_p13 }
 0x12e   :  { %388 = shalt.err (!%p385_p1)
}
 0x12f   :  { %333 = dma.vmem_to_hbm [thread:$0]  %s331_s20, 16, %s432_s1, [#allocation5]  }
 0x130   :  { %391 = dma.done.wait [#allocation5], 16  }
 0x131   :  { %392 = vsyncadd [#allocation5], 4294967280 }
 0x132   :  { %337 = vsyncpa [#allocation4], 1 }
 0x133   :  { %338 = vsyncpa [#allocation5], 1 }

</bundles_post_ra>
